<compile_context>
chip_gen: v7x
topology: tpu7x:2x2x1
jax: 0.10.0
libtpu: 0.0.40
codegen_flags: <defaults>
</compile_context>

<pallas_src>
import jax
import jax.numpy as jnp
from jax import lax
from jax.experimental import pallas as pl
from jax.experimental.pallas import tpu as pltpu


# ---------------------------------------------------------------------------
# helpers
# ---------------------------------------------------------------------------

def _sublane(dtype):
    """Rows per native sublane tile for `dtype` (8 for f32, 16 for bf16, 32 for int8)."""
    return 8 * max(1, 4 // jnp.dtype(dtype).itemsize)


def _block_vmem_bytes(bb, Sq, Sk, H, in_dtype, out_dtype, compute_dtype, needs_qk):
    """Rough VMEM footprint of one grid step (pipeline buffers + f32 intermediates)."""
    in_isz = jnp.dtype(in_dtype).itemsize
    out_isz = jnp.dtype(out_dtype).itemsize
    c_isz = jnp.dtype(compute_dtype).itemsize
    if needs_qk:
        io = (2 * bb * (Sq + 2 * Sk) * H * in_isz       # q/k/v blocks (double-buffered)
              + 2 * bb * Sq * H * out_isz)              # out block (double-buffered)
        w = 4 * H * H * c_isz + 4 * H * 4               # weights (single-buffered) + f32 biases
        interm = 4 * (bb * (Sq + 2 * Sk) * H            # f32 Q/K/V projections
                      + 2 * bb * Sq * H                 # merged ctx + fc output
                      + 2 * bb * Sq * Sk)               # per-head energy / probs
    else:                                               # Sk == 1 shortcut path
        io = 2 * bb * H * in_isz + 2 * bb * Sq * H * out_isz
        w = 2 * H * H * c_isz + 2 * H * 4
        interm = 4 * (2 * bb * H + bb * Sq * H)
    return io + w + interm


def _pick_batch_block(bs, Sq, Sk, H, in_dtype, out_dtype, compute_dtype, needs_qk,
                      target_rows=256, vmem_block_budget=48 * 1024 * 1024):
    """Largest batch block whose footprint fits the VMEM budget.

    Prefers a single grid step (the grid is a serial loop on v5e/v6e single-TC chips);
    only keeps >= 2 grid steps (v7x megacore sharding) when halving the block still
    leaves >= target_rows MXU rows per matmul. The (BB,S,H)<->(BB*S,H) reshapes are
    only enabled when S is a multiple of the dtype's sublane packing (dtype-aware).
    """
    if needs_qk:
        sub = max(_sublane(in_dtype), _sublane(out_dtype))
        if bs > 1 and (Sq % sub != 0 or Sk % sub != 0):
            return 1                                    # avoid relayout copies
    best = 1
    for bb in range(bs, 0, -1):
        if bs % bb:
            continue
        if _block_vmem_bytes(bb, Sq, Sk, H, in_dtype, out_dtype, compute_dtype,
                             needs_qk) <= vmem_block_budget:
            best = bb
            break
    rows_per_b = Sq if needs_qk else 1
    if best == bs and bs % 2 == 0 and (bs // 2) * rows_per_b >= target_rows:
        best = bs // 2                                  # keep 2 parallel steps for v7x
    return best


def _vmem_limit_bytes(block_bytes):
    # Generous but v7x-safe (64 MiB physical VMEM per TensorCore on v7x).
    return int(min(64 * 1024 * 1024, max(32 * 1024 * 1024, 2 * block_bytes)))


# ---------------------------------------------------------------------------
# kernels
# ---------------------------------------------------------------------------

def _make_attention_kernel(n_heads, compute_dtype):
    """General path (Sk > 1): QKV projections, per-head softmax attention, fused fc."""

    def kernel(q_ref, k_ref, v_ref,
               wq_ref, bq_ref, wk_ref, bk_ref, wv_ref, bv_ref,
               wfc_ref, bfc_ref, out_ref):
        BB, Sq, H = q_ref.shape
        _, Sk, _ = k_ref.shape
        hd = H // n_heads
        cdt = compute_dtype
        f32 = jnp.float32

        # Flatten the batch block to 2-D rows for the dense projections.
        # (Layout no-op: BB > 1 only when Sq/Sk are sublane-aligned for this dtype.)
        if BB == 1:
            q2, k2, v2 = q_ref[0], k_ref[0], v_ref[0]
        else:
            q2 = q_ref[...].reshape(BB * Sq, H)
            k2 = k_ref[...].reshape(BB * Sk, H)
            v2 = v_ref[...].reshape(BB * Sk, H)

        # Cast to the MXU compute dtype inside the kernel (VPU filler, free);
        # inputs stay in their original dtype in HBM / during the DMA.
        # Weights are pre-transposed; 1/sqrt(head_dim) folded into wq/bq. f32 accumulate.
        Q = jnp.dot(q2.astype(cdt), wq_ref[...], preferred_element_type=f32) + bq_ref[...]
        K = jnp.dot(k2.astype(cdt), wk_ref[...], preferred_element_type=f32) + bk_ref[...]
        V = jnp.dot(v2.astype(cdt), wv_ref[...], preferred_element_type=f32) + bv_ref[...]

        if BB > 1:
            # Reshape while still f32 (always an 8-row sublane no-op); per-head
            # slicing/casting happen afterwards so bf16 never gets reshaped.
            Q = Q.reshape(BB, Sq, H)
            K = K.reshape(BB, Sk, H)
            V = V.reshape(BB, Sk, H)

        dn = (((1,), (1,)), ((), ()))   # contract last dim vs last dim (no transposes)

        ctx_heads = []
        for h in range(n_heads):        # static unroll: n_heads is small in this module
            lo = h * hd
            Qh = Q[..., lo:lo + hd].astype(cdt)
            Kh = K[..., lo:lo + hd].astype(cdt)
            Vh = V[..., lo:lo + hd].astype(cdt)

            if BB == 1:
                e = lax.dot_general(Qh, Kh, dn, preferred_element_type=f32)   # (Sq,Sk)
            else:
                e = jnp.einsum('bqd,bkd->bqk', Qh, Kh,
                               preferred_element_type=f32)                    # (BB,Sq,Sk)

            # Numerically-stable softmax: f32 elementwise, EUP reciprocal (no VALU div).
            m = jnp.max(e, axis=-1, keepdims=True)
            ex = jnp.exp(e - m)
            p = (ex * pl.reciprocal(jnp.sum(ex, axis=-1, keepdims=True),
                                    approx=True)).astype(cdt)

            if BB == 1:
                ctx = jnp.dot(p, Vh, preferred_element_type=f32)              # (Sq,hd)
            else:
                ctx = jnp.einsum('bqk,bkd->bqd', p, Vh,
                                 preferred_element_type=f32)                  # (BB,Sq,hd)
            ctx_heads.append(ctx)

        merged = jnp.concatenate(ctx_heads, axis=-1)      # (..., H), f32
        if BB > 1:
            merged = merged.reshape(BB * Sq, H)           # f32 sublane no-op

        # Single fused output fc: one K=H matmul instead of n_heads K=head_dim matmuls.
        out = jnp.dot(merged.astype(cdt), wfc_ref[...],
                      preferred_element_type=f32) + bfc_ref[...]

        if BB == 1:
            out_ref[0] = out.astype(out_ref.dtype)
        else:
            out_ref[...] = out.reshape(BB, Sq, H).astype(out_ref.dtype)

    return kernel


def _make_sk1_kernel(compute_dtype):
    """Shortcut for Sk == 1 (chemprop cross-attention): softmax over a length-1 axis
    is identically 1, so every query row attends fully to the single key/value row:
        out[b, q, :] = (value[b, 0, :] @ Wv^T + bv) @ Wfc^T + bfc   for all q.
    Q/K projections, energy matmul and softmax are skipped entirely."""

    def kernel(v_ref, wv_ref, bv_ref, wfc_ref, bfc_ref, out_ref):
        BB, _, H = v_ref.shape
        Sq = out_ref.shape[1]
        cdt = compute_dtype
        f32 = jnp.float32

        v2 = v_ref[...][:, 0, :]                                            # (BB, H)
        Vp = jnp.dot(v2.astype(cdt), wv_ref[...],
                     preferred_element_type=f32) + bv_ref[...]              # (BB, H) f32
        y = jnp.dot(Vp.astype(cdt), wfc_ref[...],
                    preferred_element_type=f32) + bfc_ref[...]              # (BB, H) f32
        out_ref[...] = jnp.broadcast_to(y[:, None, :],
                                        (BB, Sq, H)).astype(out_ref.dtype)

    return kernel


# ---------------------------------------------------------------------------
# wrapper
# ---------------------------------------------------------------------------

def attention_block(query, key, value, params, n_heads, compute_dtype=jnp.float32):
    """query: (bs, Sq, H); key/value: (bs, Sk, H). Returns (bs, Sq, H) in query.dtype."""
    bs, Sq, H = query.shape
    _, Sk, _ = key.shape
    assert H % n_heads == 0
    hd = H // n_heads
    out_dtype = query.dtype
    wq, bq, wk, bk, wv, bv, wfc, bfc = params

    # Wrapper-side layout plumbing (one-time, free): pre-transpose all weights, fold
    # the 1/sqrt(head_dim) attention scale into the Q projection, reshape biases to
    # (1, H) f32. q/k/v are NOT cast here (cast happens inside the kernel).
    scale = jnp.asarray(float(hd) ** 0.5, jnp.float32)
    wqT = (wq.T / scale).astype(compute_dtype)
    bq2 = (bq / scale).reshape(1, H).astype(jnp.float32)
    wkT = wk.T.astype(compute_dtype)
    bk2 = bk.reshape(1, H).astype(jnp.float32)
    wvT = wv.T.astype(compute_dtype)
    bv2 = bv.reshape(1, H).astype(jnp.float32)
    wfcT = wfc.T.astype(compute_dtype)
    bfc2 = bfc.reshape(1, H).astype(jnp.float32)

    in_isz = jnp.dtype(query.dtype).itemsize
    out_isz = jnp.dtype(out_dtype).itemsize
    c_isz = jnp.dtype(compute_dtype).itemsize

    needs_qk = Sk > 1   # Sk == 1 -> softmax over a length-1 axis is identically 1

    BB = _pick_batch_block(bs, Sq, Sk, H, query.dtype, out_dtype, compute_dtype,
                           needs_qk)
    grid_b = bs // BB
    block_bytes = _block_vmem_bytes(BB, Sq, Sk, H, query.dtype, out_dtype,
                                    compute_dtype, needs_qk)

    def blk(bb, S):
        return pl.BlockSpec((bb, S, H), lambda i: (i, 0, 0))

    # Constant index maps + single pipeline buffer: weights never change across grid
    # steps, so the second pipeline buffer was wasted VMEM.
    w_spec = pl.BlockSpec((H, H), lambda i: (0, 0), pipeline_mode=pl.Buffered(1))
    b_spec = pl.BlockSpec((1, H), lambda i: (0, 0), pipeline_mode=pl.Buffered(1))

    compiler_params = pltpu.CompilerParams(
        dimension_semantics=("parallel",),
        vmem_limit_bytes=_vmem_limit_bytes(block_bytes))

    if not needs_qk:
        # --- Sk == 1 shortcut: only value / Wv / Wfc are needed (query/key not DMA'd).
        flops = int(2 * bs * H * H * 2)
        bytes_accessed = int(in_isz * bs * H + out_isz * bs * Sq * H
                             + c_isz * 2 * H * H + 4 * 2 * H)
        return pl.pallas_call(
            _make_sk1_kernel(compute_dtype),
            out_shape=jax.ShapeDtypeStruct((bs, Sq, H), out_dtype),
            grid_spec=pltpu.PrefetchScalarGridSpec(
                num_scalar_prefetch=0,
                grid=(grid_b,),
                in_specs=[blk(BB, 1),            # value
                          w_spec, b_spec,        # W_v^T, b_v
                          w_spec, b_spec],       # W_fc^T, b_fc
                out_specs=blk(BB, Sq),
            ),
            compiler_params=compiler_params,
            cost_estimate=pl.CostEstimate(flops=flops, transcendentals=0,
                                          bytes_accessed=bytes_accessed),
        )(value, wvT, bv2, wfcT, bfc2)

    # --- General path (Sk > 1) ---
    flops = int(2 * bs * (Sq + 2 * Sk) * H * H          # QKV projections
                + 2 * bs * n_heads * Sq * Sk * hd * 2   # energy + context
                + 2 * bs * Sq * H * H)                  # fused output fc
    transcendentals = int(bs * n_heads * Sq * Sk)       # softmax exp
    bytes_accessed = int(in_isz * bs * (Sq + 2 * Sk) * H
                         + out_isz * bs * Sq * H
                         + c_isz * 4 * H * H + 4 * 4 * H)

    return pl.pallas_call(
        _make_attention_kernel(n_heads, compute_dtype),
        out_shape=jax.ShapeDtypeStruct((bs, Sq, H), out_dtype),
        grid_spec=pltpu.PrefetchScalarGridSpec(
            num_scalar_prefetch=0,
            grid=(grid_b,),
            in_specs=[blk(BB, Sq), blk(BB, Sk), blk(BB, Sk),
                      w_spec, b_spec,        # W_q^T (pre-scaled), b_q (pre-scaled)
                      w_spec, b_spec,        # W_k^T, b_k
                      w_spec, b_spec,        # W_v^T, b_v
                      w_spec, b_spec],       # W_fc^T, b_fc
            out_specs=blk(BB, Sq),
        ),
        compiler_params=compiler_params,
        cost_estimate=pl.CostEstimate(flops=flops, transcendentals=transcendentals,
                                      bytes_accessed=bytes_accessed),
    )(query, key, value, wqT, bq2, wkT, bk2, wvT, bv2, wfcT, bfc2)


# ---------------------------------------------------------------------------
# pure-JAX reference (mirrors the PyTorch forward, eval mode, mask=None)
# ---------------------------------------------------------------------------

def _reference(query, key, value, params, n_heads):
    wq, bq, wk, bk, wv, bv, wfc, bfc = params
    bs, Sq, H = query.shape
    hd = H // n_heads
    Q = query @ wq.T + bq
    K = key @ wk.T + bk
    V = value @ wv.T + bv

    def split(x):
        b, s, _ = x.shape
        return x.reshape(b, s, n_heads, hd).transpose(0, 2, 1, 3)

    Qh, Kh, Vh = split(Q), split(K), split(V)
    energy = jnp.einsum("bhqd,bhkd->bhqk", Qh, Kh) / jnp.sqrt(jnp.float32(hd))
    attn = jax.nn.softmax(energy, axis=-1)
    ctx = jnp.einsum("bhqk,bhkd->bhqd", attn, Vh)
    ctx = ctx.transpose(0, 2, 1, 3).reshape(bs, Sq, H)
    return ctx @ wfc.T + bfc


# ---------------------------------------------------------------------------
# self-test
# ---------------------------------------------------------------------------

if __name__ == "__main__":
    f32 = jnp.float32
    root = jax.random.PRNGKey(0)

    def make_inputs(key0, bs, Sq, Sk, H):
        ks = jax.random.split(key0, 11)
        q = jax.random.normal(ks[0], (bs, Sq, H), f32)
        k = jax.random.normal(ks[1], (bs, Sk, H), f32)
        v = jax.random.normal(ks[2], (bs, Sk, H), f32)
        init = lambda kk, shape: jax.random.normal(kk, shape, f32) * 0.05
        params = (init(ks[3], (H, H)), init(ks[4], (H,)),
                  init(ks[5], (H, H)), init(ks[6], (H,)),
                  init(ks[7], (H, H)), init(ks[8], (H,)),
                  init(ks[9], (H, H)), init(ks[10], (H,)))
        return q, k, v, params

    # Config 1: chemprop cross-attention shapes from the module docstring
    # (batch=2, smiles_length=8, D-MPNN key/value length 1, hidden=32, 4 heads).
    # Exercises the Sk==1 algebraic shortcut kernel.
    bs, Sq, Sk, H, n_heads = 2, 8, 1, 32, 4
    q, k, v, params = make_inputs(jax.random.fold_in(root, 0), bs, Sq, Sk, H)
    out = jax.block_until_ready(attention_block(q, k, v, params, n_heads))
    ref = _reference(q, k, v, params, n_heads)
    assert out.shape == (bs, Sq, H)
    assert jnp.allclose(out, ref, atol=5e-3, rtol=5e-3), "f32 cross-attention mismatch"

    # Config 2: self-attention shapes; exercises the general batched (BB>1) path with
    # batched 3-D head contractions and the single fused output fc (bs=8 -> BB=8,
    # single grid step since everything fits VMEM).
    bs2, S2, H2, nh2 = 8, 8, 32, 4
    q2, k2, v2, params2 = make_inputs(jax.random.fold_in(root, 1), bs2, S2, S2, H2)
    out2 = jax.block_until_ready(attention_block(q2, k2, v2, params2, nh2))
    ref2 = _reference(q2, k2, v2, params2, nh2)
    assert out2.shape == (bs2, S2, H2)
    assert jnp.allclose(out2, ref2, atol=5e-3, rtol=5e-3), "f32 self-attention mismatch"

    # Same config with bf16 MXU operands (inputs stay f32 in HBM; in-kernel cast,
    # f32 accumulation, f32 softmax).
    out2_bf16 = jax.block_until_ready(
        attention_block(q2, k2, v2, params2, nh2, compute_dtype=jnp.bfloat16))
    assert jnp.allclose(out2_bf16, ref2, atol=3e-2, rtol=3e-2), "bf16 self-attention mismatch"

    # Config 3: non-sublane-aligned query length (Sq=5) -> dtype-aware gate falls back
    # to BB=1, exercising the per-batch (2-D) kernel path.
    bs3, Sq3, Sk3, H3, nh3 = 2, 5, 8, 32, 4
    q3, k3, v3, params3 = make_inputs(jax.random.fold_in(root, 2), bs3, Sq3, Sk3, H3)
    out3 = jax.block_until_ready(attention_block(q3, k3, v3, params3, nh3))
    ref3 = _reference(q3, k3, v3, params3, nh3)
    assert out3.shape == (bs3, Sq3, H3)
    assert jnp.allclose(out3, ref3, atol=5e-3, rtol=5e-3), "f32 unaligned-Sq mismatch"

    print("KERNEL_OK")
</pallas_src>

<mosaic_0001>
module attributes {stable_mosaic.version = 11 : i64} {
  func.func @kernel(%arg0: i32, %arg1: memref<2x1x32xf32, #tpu.memory_space<vmem>>, %arg2: memref<32x32xf32, #tpu.memory_space<vmem>>, %arg3: memref<1x32xf32, #tpu.memory_space<vmem>>, %arg4: memref<32x32xf32, #tpu.memory_space<vmem>>, %arg5: memref<1x32xf32, #tpu.memory_space<vmem>>, %arg6: memref<2x8x32xf32, #tpu.memory_space<vmem>>) attributes {dimension_semantics = [#tpu.dimension_semantics<parallel>], iteration_bounds = array<i64: 1>, scalar_prefetch = 0 : i64, scratch_operands = 0 : i64, tpu.core_type = #tpu.core_type<tc>, window_params = [{transform_indices = @transform_0, window_bounds = array<i64: 2, 1, 32>}, {pipeline_mode = #tpu.pipeline_mode<synchronous>, transform_indices = @transform_1, window_bounds = array<i64: 32, 32>}, {pipeline_mode = #tpu.pipeline_mode<synchronous>, transform_indices = @transform_2, window_bounds = array<i64: 1, 32>}, {pipeline_mode = #tpu.pipeline_mode<synchronous>, transform_indices = @transform_3, window_bounds = array<i64: 32, 32>}, {pipeline_mode = #tpu.pipeline_mode<synchronous>, transform_indices = @transform_4, window_bounds = array<i64: 1, 32>}, {transform_indices = @transform_5, window_bounds = array<i64: 2, 8, 32>}]} {
    %c0 = arith.constant 0 : index
    %c0_0 = arith.constant 0 : index
    %c0_1 = arith.constant 0 : index
    %0 = vector.load %arg1[%c0, %c0_0, %c0_1] : memref<2x1x32xf32, #tpu.memory_space<vmem>>, vector<2x1x32xf32>
    %1 = vector.shape_cast %0 : vector<2x1x32xf32> to vector<2x32xf32>
    %c0_2 = arith.constant 0 : index
    %c0_3 = arith.constant 0 : index
    %2 = vector.load %arg2[%c0_2, %c0_3] : memref<32x32xf32, #tpu.memory_space<vmem>>, vector<32x32xf32>
    %cst = arith.constant dense<0.000000e+00> : vector<2x32xf32>
    %3 = tpu.matmul %1, %2, %cst {dimension_numbers = #tpu.dot_dimension_numbers<[1], [0], [0], [1], [0, 0, 1, 1], [], []>} : vector<2x32xf32>, vector<32x32xf32>, vector<2x32xf32> -> vector<2x32xf32>
    %c0_4 = arith.constant 0 : index
    %c0_5 = arith.constant 0 : index
    %4 = vector.load %arg3[%c0_4, %c0_5] : memref<1x32xf32, #tpu.memory_space<vmem>>, vector<1x32xf32>
    %5 = vector.broadcast %4 : vector<1x32xf32> to vector<2x32xf32>
    %6 = arith.addf %3, %5 : vector<2x32xf32>
    %c0_6 = arith.constant 0 : index
    %c0_7 = arith.constant 0 : index
    %7 = vector.load %arg4[%c0_6, %c0_7] : memref<32x32xf32, #tpu.memory_space<vmem>>, vector<32x32xf32>
    %cst_8 = arith.constant dense<0.000000e+00> : vector<2x32xf32>
    %8 = tpu.matmul %6, %7, %cst_8 {dimension_numbers = #tpu.dot_dimension_numbers<[1], [0], [0], [1], [0, 0, 1, 1], [], []>} : vector<2x32xf32>, vector<32x32xf32>, vector<2x32xf32> -> vector<2x32xf32>
    %c0_9 = arith.constant 0 : index
    %c0_10 = arith.constant 0 : index
    %9 = vector.load %arg5[%c0_9, %c0_10] : memref<1x32xf32, #tpu.memory_space<vmem>>, vector<1x32xf32>
    %10 = vector.broadcast %9 : vector<1x32xf32> to vector<2x32xf32>
    %11 = arith.addf %8, %10 : vector<2x32xf32>
    %12 = vector.shape_cast %11 : vector<2x32xf32> to vector<2x1x32xf32>
    %13 = vector.shape_cast %12 : vector<2x1x32xf32> to vector<2x1x32xf32>
    %14 = vector.broadcast %13 : vector<2x1x32xf32> to vector<2x8x32xf32>
    %c0_11 = arith.constant 0 : index
    %c0_12 = arith.constant 0 : index
    %c0_13 = arith.constant 0 : index
    %15 = vector.load %arg6[%c0_11, %c0_12, %c0_13] : memref<2x8x32xf32, #tpu.memory_space<vmem>>, vector<2x8x32xf32>
    tpu.vector_store %arg6[%c0_11, %c0_12, %c0_13], %14 {strides = array<i32>} : memref<2x8x32xf32, #tpu.memory_space<vmem>>, vector<2x8x32xf32>,
    return
  }
  func.func @transform_0(%arg0: i32) -> (i32, i32, i32) {
    %c0_i32 = arith.constant 0 : i32
    %c0_i32_0 = arith.constant 0 : i32
    %c0_i32_1 = arith.constant 0 : i32
    return %arg0, %c0_i32, %c0_i32_0 : i32, i32, i32
  }
  func.func @transform_1(%arg0: i32) -> (i32, i32) {
    %c0_i32 = arith.constant 0 : i32
    %c0_i32_0 = arith.constant 0 : i32
    %c0_i32_1 = arith.constant 0 : i32
    return %c0_i32, %c0_i32_0 : i32, i32
  }
  func.func @transform_2(%arg0: i32) -> (i32, i32) {
    %c0_i32 = arith.constant 0 : i32
    %c0_i32_0 = arith.constant 0 : i32
    %c0_i32_1 = arith.constant 0 : i32
    return %c0_i32, %c0_i32_0 : i32, i32
  }
  func.func @transform_3(%arg0: i32) -> (i32, i32) {
    %c0_i32 = arith.constant 0 : i32
    %c0_i32_0 = arith.constant 0 : i32
    %c0_i32_1 = arith.constant 0 : i32
    return %c0_i32, %c0_i32_0 : i32, i32
  }
  func.func @transform_4(%arg0: i32) -> (i32, i32) {
    %c0_i32 = arith.constant 0 : i32
    %c0_i32_0 = arith.constant 0 : i32
    %c0_i32_1 = arith.constant 0 : i32
    return %c0_i32, %c0_i32_0 : i32, i32
  }
  func.func @transform_5(%arg0: i32) -> (i32, i32, i32) {
    %c0_i32 = arith.constant 0 : i32
    %c0_i32_0 = arith.constant 0 : i32
    %c0_i32_1 = arith.constant 0 : i32
    return %arg0, %c0_i32, %c0_i32_0 : i32, i32, i32
  }
}

</mosaic_0001>

<bundles_post_ra>
// kernel: tpu_custom_call.1
= control target key start
LH: loop header
LB: loop body
LE: loop exit
PB: predicated region body
PF: predicated region fallthrough
CT: control target
= control target key end

     0   :  { %10 = vsyncpa [#allocation3], 0  ;;  %s565_s0 = inlined_call_operand.hbm [shape: f32[2,1,32], index: 0, kind: input, shape index: {}]   ;;  %s566_s1 = inlined_call_operand.hbm [shape: f32[32,32], index: 1, kind: input, shape index: {}]   ;;  %s567_s2 = inlined_call_operand.vmem [shape: f32[1,32], index: 2, kind: input, shape index: {}]   ;;  %s568_s3 = inlined_call_operand.hbm [shape: f32[32,32], index: 3, kind: input, shape index: {}]   ;;  %s569_s4 = inlined_call_operand.vmem [shape: f32[1,32], index: 4, kind: input, shape index: {}]   ;;  %s570_s5 = inlined_call_operand.hbm [shape: f32[2,8,32], index: 5, kind: output, shape index: {}]  }
   0x1   :  { %11 = vsyncpa [#allocation6], 0 }
   0x2   :  { %12 = vsyncpa [#allocation4], 0  ;;  %s456_s18 = smov [#allocation5]   ;;  %s362_s22 = scalar_lea.hbm %s566_s1, 512 }
   0x3   :  { %s30_s19 = sshll.u32 %s456_s18, 4  ;;  %p363_p0 = scmp.ne.s32.totalorder %s566_s1, %s362_s22  ;;  %s31_s19 = int_to_ptr.vmem [resolvable:$true] %s30_s19 }
   0x4   :  { %p366_p1 = scmp.lt.u32.totalorder %s362_s22, %s566_s1 }
   0x6   :  { %p368_p2 = pnand %p366_p1, %p363_p0 }
   0x8   :  { %371 = shalt.err (!%p368_p2)
}
   0x9   :  { %s372_s27 = scalar_lea.vmem %s31_s19, 512  ;;  %p377_p4 = scmp.lt.s32.totalorder %s31_s19, %s31_s19 }
   0xa   :  { %p373_p3 = scmp.ne.s32.totalorder %s31_s19, %s372_s27  ;;  %p378_p5 = scmp.lt.s32.totalorder %s372_s27, %s372_s27 }
   0xc   :  { %p379_p6 = por %p378_p5, %p377_p4 }
   0xe   :  { %p380_p7 = pnand %p379_p6, %p373_p3 }
  0x10   :  { %383 = shalt.err (!%p380_p7)
}
  0x11   :  { %s457_s28 = smov 128   ;;  %s458_s29 = smov 8  }
  0x12   :  { %36 = dma.hbm_to_vmem [thread:$0]  %s566_s1, 512, %s31_s19, [#allocation6], %s457_s28, %s457_s28, %s458_s29  }
  0x13   :  { %s459_s7 = smov [#allocation2]   ;;  %s384_s11 = scalar_lea.hbm %s565_s0, 32 }
  0x14   :  { %s18_s8 = sshll.u32 %s459_s7, 4  ;;  %p385_p8 = scmp.ne.s32.totalorder %s565_s0, %s384_s11  ;;  %s19_s8 = int_to_ptr.vmem [resolvable:$true] %s18_s8 }
  0x15   :  { %p388_p9 = scmp.lt.u32.totalorder %s384_s11, %s565_s0 }
  0x17   :  { %p390_p10 = pnand %p388_p9, %p385_p8 }
  0x19   :  { %393 = shalt.err (!%p390_p10)
}
  0x1a   :  { %s394_s16 = scalar_lea.vmem %s19_s8, 32  ;;  %p399_p12 = scmp.lt.s32.totalorder %s19_s8, %s19_s8 }
  0x1b   :  { %p395_p11 = scmp.ne.s32.totalorder %s19_s8, %s394_s16  ;;  %p400_p13 = scmp.lt.s32.totalorder %s394_s16, %s394_s16 }
  0x1d   :  { %p401_p0 = por %p400_p13, %p399_p12 }
  0x1f   :  { %p402_p1 = pnand %p401_p0, %p395_p11 }
  0x21   :  { %405 = shalt.err (!%p402_p1)
}
  0x22   :  { %s460_s1 = smov 16   ;;  %s461_s17 = smov 1  }
  0x23   :  { %24 = dma.hbm_to_vmem [thread:$0]  %s565_s0, 32, %s19_s8, [#allocation3], %s460_s1, %s460_s1, %s461_s17  }
  0x24   :  { %s462_s20 = smov [#allocation7]   ;;  %s406_s24 = scalar_lea.hbm %s568_s3, 512 }
  0x25   :  { %s44_s21 = sshll.u32 %s462_s20, 4  ;;  %p407_p2 = scmp.ne.s32.totalorder %s568_s3, %s406_s24  ;;  %s45_s21 = int_to_ptr.vmem [resolvable:$true] %s44_s21 }
  0x26   :  { %p410_p3 = scmp.lt.u32.totalorder %s406_s24, %s568_s3 }
  0x28   :  { %p412_p4 = pnand %p410_p3, %p407_p2 }
  0x2a   :  { %415 = shalt.err (!%p412_p4)
}
  0x2b   :  { %s416_s6 = scalar_lea.vmem %s45_s21, 512  ;;  %p421_p6 = scmp.lt.s32.totalorder %s45_s21, %s45_s21 }
  0x2c   :  { %p417_p5 = scmp.ne.s32.totalorder %s45_s21, %s416_s6  ;;  %p422_p7 = scmp.lt.s32.totalorder %s416_s6, %s416_s6 }
  0x2e   :  { %p423_p8 = por %p422_p7, %p421_p6 }
  0x30   :  { %p424_p9 = pnand %p423_p8, %p417_p5 }
  0x32   :  { %427 = shalt.err (!%p424_p9)
}
  0x33   :  { %50 = dma.hbm_to_vmem [thread:$0]  %s568_s3, 512, %s45_s21, [#allocation6], %s457_s28, %s457_s28, %s458_s29  }
  0x34   :  { %450 = dma.done.wait [#allocation3], 32  }
  0x35   :  { %451 = vsyncadd [#allocation3], 4294967264 }
  0x36   :  { %452 = dma.done.wait [#allocation6], 1024  }
  0x37   :  { %453 = vsyncadd [#allocation6], 4294966272  ;;  %v81_v0 = vlaneseq  ;;  %v463_v1 = vmov 0.0|0.0   ;;  %vm464_vm0 = vmmov 0   ;;  %v465_v2 = vmov 0.0   ;;  %v64_v7 = vld [vmem:[#allocation5] sm:$0xff] }
  0x38   :  { %338 = vmatprep.subr.bf16.mxu0 %v463_v1  ;;  %324 = vmatprep.mubr.msk.f32.mxu0 %vm464_vm0, %v465_v2  ;;  %v466_v3 = vmov 1966171168   ;;  %v65_v8 = vld [vmem:[#allocation5 + $0x8] sm:$0xff]  ;;  %v66_v9 = vld [vmem:[#allocation5 + $0x10] sm:$0xff]  ;;  %v67_v12 = vld [vmem:[#allocation5 + $0x18] sm:$0xff]  ;;  %vm92_vm1 = vcmask 261120  }
  0x39   :  { %v79_v4 = vunpack.c.l.s4 %v466_v3  ;;  %344 = vmatprep.subr.bf16.mxu1 %v463_v1  ;;  %335 = vmatprep.mubr.msk.f32.mxu1 %vm464_vm0, %v465_v2  ;;  %v82_v5 = vshrl.u32 %v81_v0, 7  ;;  %v339_v11 = vpack.c.bf16 %v65_v8, %v64_v7  ;;  %v62_v13 = vld [vmem:[#allocation2] sm:$0x1]  ;;  %v63_v14 = vld [vmem:[#allocation2 + $0x1] sm:$0x1]  ;;  %v165_v16 = vld [vmem:[#allocation7] sm:$0xff]  ;;  %v342_v18 = vpack.c.bf16 %v67_v12, %v66_v9 }
  0x3a   :  { %v77_v15 = vcombine.low %v62_v13, %v63_v14  ;;  %v166_v17 = vld [vmem:[#allocation7 + $0x8] sm:$0xff]  ;;  %v167_v22 = vld [vmem:[#allocation7 + $0x10] sm:$0xff]  ;;  %v168_v23 = vld [vmem:[#allocation7 + $0x18] sm:$0xff]  ;;  %s467_s11 = smov [#allocation8]  }
  0x3b   :  { %v80_v6 = vunpack.c.0.s8 %v79_v4  ;;  %340 = vmatpush3.bf16.msra.mxu0 %v339_v11  ;;  %v345_v19 = vpack.c.bf16 %v166_v17, %v165_v16  ;;  %v348_v24 = vpack.c.bf16 %v168_v23, %v167_v22  ;;  %v302_v25 = vld [vmem:[%s567_s2] ss:$0 sm:$0xff]  ;;  %v274_v34 = vsub.s32 0, %v82_v5  ;;  %s289_s12 = sshll.u32 %s467_s11, 4  ;;  %s290_s12 = int_to_ptr.vmem [resolvable:$true] %s289_s12 }
  0x3c   :  { %341 = vmatprep.subr.bf16.mxu0 %v463_v1  ;;  %v304_v29 = vld [vmem:[%s569_s4] ss:$0 sm:$0xff]  ;;  %s428_s2 = scalar_lea.vmem %s290_s12, 256  ;;  %p433_p11 = scmp.lt.s32.totalorder %s290_s12, %s290_s12 }
  0x3d   :  { %v83_v10 = vsub.s32 %v80_v6, %v82_v5  ;;  %346 = vmatpush3.bf16.msra.mxu1 %v345_v19  ;;  %p429_p10 = scmp.ne.s32.totalorder %s290_s12, %s428_s2  ;;  %p434_p12 = scmp.lt.s32.totalorder %s428_s2, %s428_s2 }
  0x3e   :  { %347 = vmatprep.subr.bf16.mxu1 %v463_v1 }
  0x3f   :  { %v84_v20 = vrot.slane %v77_v15, %v83_v10  ;;  %343 = vmatpush3.bf16.msra.mxu0 %v342_v18  ;;  %p435_p13 = por %p434_p12, %p433_p11 }
  0x41   :  { %v91_v21 = vrot.slane %v84_v20, %v83_v10  ;;  %349 = vmatpush3.bf16.msra.mxu1 %v348_v24  ;;  %p436_p0 = pnand %p435_p13, %p429_p10 }
  0x43   :  { %325 = vmatmul.mubr.msk.f32.vlgmr.msra.gmra.mrb[0].mxu0 %vm92_vm1, %v91_v21 }
 0x116   :  { %v161_v26 = vpop.f32.mrb[0].mxu0 }
 0x117   :  { %v162_v27 = vadd.f32 %v302_v25, %v161_v26  ;;  %v326_v28 = vpop.f32.mrb[1].mxu0 }
 0x119   :  { %336 = vmatmul.mubr.msk.f32.vlgmr.msra.gmra.mrb[0].mxu1 %vm92_vm1, %v162_v27 }
 0x1ec   :  { %v245_v30 = vpop.f32.mrb[0].mxu1 }
 0x1ed   :  { %v246_v31 = vadd.f32 %v304_v29, %v245_v30  ;;  %v337_v32 = vpop.f32.mrb[1].mxu1 }
 0x1ef   :  { %v256_v33 = vrot.slane %v246_v31, %v83_v10 }
 0x1f1   :  { %v257_v35 = vcombine.high %v256_v33, %v256_v33  ;;  %v264_v36 = vrot.slane %v256_v33, %v83_v10 }
 0x1f3   :  { %v271_v37 = vrot.slane %v257_v35, %v83_v10  ;;  %v275_v38 = vrot.slane %v264_v36, %v274_v34 }
 0x1f5   :  { %282 = vst.msk [vmem:[#allocation8] sm:$0xff] %vm92_vm1, %v275_v38  ;;  %v279_v39 = vrot.slane %v271_v37, %v274_v34 }
 0x1f7   :  { %283 = vst.msk [vmem:[#allocation8 + $0x8] sm:$0xff] %vm92_vm1, %v279_v39 }
 0x1f8   :  { %439 = shalt.err (!%p436_p0)
}
 0x1f9   :  { %s440_s14 = scalar_lea.hbm %s570_s5, 256 }
 0x1fa   :  { %p441_p1 = scmp.ne.s32.totalorder %s570_s5, %s440_s14  ;;  %p444_p2 = scmp.lt.u32.totalorder %s440_s14, %s570_s5 }
 0x1fc   :  { %p446_p3 = pnand %p444_p2, %p441_p1 }
 0x1fe   :  { %449 = shalt.err (!%p446_p3)
}
 0x1ff   :  { %295 = dma.vmem_to_hbm [thread:$0]  %s290_s12, 256, %s570_s5, [#allocation4], %s457_s28, %s457_s28, %s458_s29  }
 0x200   :  { %454 = dma.done.wait [#allocation4], 256  }
 0x201   :  { %455 = vsyncadd [#allocation4], 4294967040 }
 0x202   :  { %299 = vsyncpa [#allocation3], 1 }
 0x203   :  { %300 = vsyncpa [#allocation6], 1 }
 0x204   :  { %301 = vsyncpa [#allocation4], 1 }

</bundles_post_ra>
